<compile_context>
chip_gen: v6e
topology: v6e:2x2x1
jax: 0.10.0
libtpu: 0.0.40
codegen_flags: <defaults>
</compile_context>

<pallas_src>
import functools

import jax
import jax.numpy as jnp
from jax.experimental import pallas as pl
from jax.experimental.pallas import tpu as pltpu


_LAYER_DIMS = ((16, 16), (16, 16), (16, 32), (32, 32), (32, 1))  # (cin, cout)
_MAX_COUT = 32
_MAX_3CIN = 96
# Per-tile flattened lane target: wide enough to amortise the ~0.35us/step
# pipeline overhead and the fill/drain of 5 small dependent dots, small enough
# that the working set stays well inside the 16 MiB (v5e) / 32 MiB (v6e/v7x)
# scoped-VMEM defaults.  If this is pushed past ~16K lanes, also raise
# vmem_limit_bytes in pltpu.CompilerParams (and mind v7x's 64 MiB physical VMEM).
_TARGET_LANES = 8192


def _leaky_relu(x, slope=0.01):
    return jnp.where(x > 0, x, slope * x)


def _model_kernel(x_ref, w_ref, b_ref, out_ref, *, L, TB):
    P = x_ref.shape[2]

    # ---- positional masks, hoisted: computed once, shared by all 5 layers ----
    col = jax.lax.broadcasted_iota(jnp.int32, (1, P), 1)
    pos = col % L                         # lane position inside its batch segment
    has_left = jnp.broadcast_to(pos != 0, (_MAX_COUT, P))
    has_right = jnp.broadcast_to(pos != L - 1, (_MAX_COUT, P))

    # bf16 activation path between layers; f32 only for accumulate / softmax.
    h = x_ref[0].astype(jnp.bfloat16)                       # (16, P)
    logits = None
    for idx, (cin, cout) in enumerate(_LAYER_DIMS):
        # tap k=0 reads x[t-1] (zero at t==0); tap k=2 reads x[t+1] (zero at
        # t==L-1).  The wrapped lanes of the rolls only ever land on masked
        # positions, so batch segments and the trailing lane padding never
        # leak into each other.
        left = jnp.where(has_left[:cin], jnp.roll(h, 1, axis=1), 0)
        right = jnp.where(has_right[:cin], jnp.roll(h, -1, axis=1), 0)
        xstack = jnp.concatenate([left, h, right], axis=0)  # (3*cin, P) bf16

        cout_p = max(cout, 8)             # keep the MXU M-dim sublane aligned
        w = w_ref[idx, :cout_p, :3 * cin]                   # bf16, static slice
        b = b_ref[idx, :cout, :]                            # (cout, 1) f32
        acc = jnp.dot(w, xstack, preferred_element_type=jnp.float32)[:cout] + b
        if idx < len(_LAYER_DIMS) - 1:
            h = _leaky_relu(acc).astype(jnp.bfloat16)
        else:
            logits = acc                                    # (1, P) f32

    # ---- segmented softmax: one length-L segment per batch element ----
    valid = col < TB * L

    def seg_rotate(v, s):
        # v[col] <- v[seg_start + (pos + s) % L].  Valid lanes never read
        # outside their own segment (wrapped reads land on masked positions).
        fwd = jnp.roll(v, -s, axis=1)       # v[col + s]
        back = jnp.roll(v, L - s, axis=1)   # v[col + s - L]
        return jnp.where(pos + s < L, fwd, back)

    # Per-segment max via circular recursive doubling: O(log L), TB-independent.
    m = logits
    s = 1
    while s < L:
        m = jnp.maximum(m, seg_rotate(m, s))
        s *= 2

    e = jnp.exp(jnp.where(valid, logits - m, -jnp.inf))     # exactly 0 on lane pad

    # Per-segment sum: masked suffix-sum doubling (position p -> sum over [p, L)),
    # then broadcast the segment total back to every position.  All terms are
    # >= 0, so the total equals the per-segment max of the suffix sums.
    ssum = e
    s = 1
    while s < L:
        ssum = ssum + jnp.where(pos + s < L, jnp.roll(ssum, -s, axis=1), 0.0)
        s *= 2
    tot = ssum
    s = 1
    while s < L:
        tot = jnp.maximum(tot, seg_rotate(tot, s))
        s *= 2
    tot = jnp.where(valid, tot, 1.0)

    out_ref[0] = e / tot                                    # lane-dense (1, P) store


def _pack_params(params):
    """Pack the 5 conv layers into one bf16 weight slab and one f32 bias slab."""
    Wp = jnp.zeros((len(_LAYER_DIMS), _MAX_COUT, _MAX_3CIN), jnp.float32)
    Bp = jnp.zeros((len(_LAYER_DIMS), _MAX_COUT, 1), jnp.float32)
    for i, (w, b) in enumerate(params[:5]):
        cout, cin, k = w.shape
        wf = jnp.transpose(w, (0, 2, 1)).reshape(cout, k * cin)  # taps as blocks of cin
        Wp = Wp.at[i, :cout, :k * cin].set(wf)
        Bp = Bp.at[i, :cout, 0].set(b)
    return Wp.astype(jnp.bfloat16), Bp


def _choose_tb(B, L):
    """Batch elements per grid step so the flattened lane width ~ _TARGET_LANES."""
    tb = max(1, min(B, _TARGET_LANES // max(L, 1)))
    # Keep >= 2 grid steps on non-trivial problems so dimension_semantics
    # ("parallel",) can feed both TensorCores on v7x.  (Best balance there also
    # wants an even tile count; an odd count just idles one TC for one step.)
    if tb == B and B > 1 and B * L >= 4096:
        tb = pl.cdiv(B, 2)
    return tb


def model_forward(x, params, *, tile_batch=None):
    """x: (B, 16, L) f32.  Returns (softmax_out (B, L), op_w (1,))."""
    B, C, L = x.shape
    assert C == 16

    Wp, Bp = _pack_params(params)
    op_w = params[5]

    TB = tile_batch if tile_batch is not None else _choose_tb(B, L)
    B_pad = pl.cdiv(B, TB) * TB
    if B_pad > B:                         # pad the batch instead of shrinking TB
        x = jnp.pad(x, ((0, B_pad - B), (0, 0), (0, 0)))
    ntiles = B_pad // TB
    seg_len = TB * L
    P = pl.cdiv(seg_len, 128) * 128
    # Layout invariant the in-kernel edge masking relies on: segments are
    # contiguous along lanes and any lane padding sits strictly at the tail.
    assert P % 128 == 0 and P >= seg_len and seg_len == TB * L

    # (B_pad, C, L) -> (ntiles, C, TB*L) with batch folded into lanes; pad lanes.
    xt = (x.reshape(ntiles, TB, C, L)
           .transpose(0, 2, 1, 3)
           .reshape(ntiles, C, seg_len))
    if P > seg_len:
        xt = jnp.pad(xt, ((0, 0), (0, 0), (0, P - seg_len)))

    kernel = functools.partial(_model_kernel, L=L, TB=TB)
    out = pl.pallas_call(
        kernel,
        out_shape=jax.ShapeDtypeStruct((ntiles, 1, P), jnp.float32),
        grid=(ntiles,),
        in_specs=[
            pl.BlockSpec((1, C, P), lambda i: (i, 0, 0)),
            pl.BlockSpec(Wp.shape, lambda i: (0, 0, 0)),   # resident packed weights
            pl.BlockSpec(Bp.shape, lambda i: (0, 0, 0)),   # resident packed biases
        ],
        out_specs=pl.BlockSpec((1, 1, P), lambda i: (i, 0, 0)),
        compiler_params=pltpu.CompilerParams(
            dimension_semantics=("parallel",)),
    )(xt, Wp, Bp)

    out = out.reshape(ntiles, P)[:, :seg_len].reshape(B_pad, L)[:B]
    return out, op_w


def init_params(key):
    def conv_init(key, cout, cin, k=3):
        kw, kb = jax.random.split(key)
        fan_in = cin * k
        bound = 1.0 / jnp.sqrt(fan_in)
        w = jax.random.uniform(kw, (cout, cin, k), jnp.float32, -bound, bound)
        b = jax.random.uniform(kb, (cout,), jnp.float32, -bound, bound)
        return w, b

    keys = jax.random.split(key, 6)
    p1 = conv_init(keys[0], 16, 16)
    p2 = conv_init(keys[1], 16, 16)
    p3 = conv_init(keys[2], 32, 16)
    p4 = conv_init(keys[3], 32, 32)
    p5 = conv_init(keys[4], 1, 32)
    op_w = jax.random.normal(keys[5], (1,), jnp.float32)
    return (p1, p2, p3, p4, p5, op_w)


def _reference_forward(x, params):
    """Pure-JAX f32 reference for sanity checking."""
    (w1, b1), (w2, b2), (w3, b3), (w4, b4), (w5, b5), op_w = params

    def conv(x, w, b):
        out = jax.lax.conv_general_dilated(
            x, w, window_strides=(1,), padding=((1, 1),),
            dimension_numbers=("NCH", "OIH", "NCH"))
        return out + b[None, :, None]

    h = jax.nn.leaky_relu(conv(x, w1, b1), 0.01)
    h = jax.nn.leaky_relu(conv(h, w2, b2), 0.01)
    h = jax.nn.leaky_relu(conv(h, w3, b3), 0.01)
    h = jax.nn.leaky_relu(conv(h, w4, b4), 0.01)
    h = conv(h, w5, b5)
    h = h.reshape(h.shape[0], -1)
    return jax.nn.softmax(h, axis=1), op_w


if __name__ == "__main__":
    key = jax.random.PRNGKey(0)
    kp, kx = jax.random.split(key)
    params = init_params(kp)

    # Case 1: base shapes (single tile, power-of-two L).
    B, C, L = 2, 16, 16
    x = jax.random.normal(kx, (B, C, L), jnp.float32)
    out, op_w = model_forward(x, params)
    out = jax.block_until_ready(out)
    op_w = jax.block_until_ready(op_w)
    ref_out, _ = _reference_forward(x, params)
    assert out.shape == (B, L)
    # bf16 MXU operands / bf16 inter-layer activations with f32 accumulation.
    assert jnp.allclose(out, ref_out, atol=2e-2, rtol=2e-2)
    assert jnp.allclose(jnp.sum(out, axis=1), 1.0, atol=1e-3)

    # Case 2: non-power-of-two L with lane padding (P > TB*L).
    x2 = jax.random.normal(jax.random.PRNGKey(1), (3, 16, 20), jnp.float32)
    out2, _ = model_forward(x2, params)
    out2 = jax.block_until_ready(out2)
    ref2, _ = _reference_forward(x2, params)
    assert jnp.allclose(out2, ref2, atol=2e-2, rtol=2e-2)

    # Case 3: multi-tile grid with host-side batch padding (B % TB != 0).
    x3 = jax.random.normal(jax.random.PRNGKey(2), (5, 16, 16), jnp.float32)
    out3, _ = model_forward(x3, params, tile_batch=2)
    out3 = jax.block_until_ready(out3)
    ref3, _ = _reference_forward(x3, params)
    assert jnp.allclose(out3, ref3, atol=2e-2, rtol=2e-2)

    print("KERNEL_OK")
</pallas_src>

<mosaic_0001>
module attributes {stable_mosaic.version = 11 : i64} {
  func.func @_model_kernel(%arg0: i32, %arg1: memref<1x16x128xf32, #tpu.memory_space<vmem>>, %arg2: memref<5x32x96xbf16, #tpu.memory_space<vmem>>, %arg3: memref<5x32x1xf32, #tpu.memory_space<vmem>>, %arg4: memref<1x1x128xf32, #tpu.memory_space<vmem>>) attributes {dimension_semantics = [#tpu.dimension_semantics<parallel>], iteration_bounds = array<i64: 1>, scalar_prefetch = 0 : i64, scratch_operands = 0 : i64, tpu.core_type = #tpu.core_type<tc>, window_params = [{transform_indices = @transform_0, window_bounds = array<i64: 1, 16, 128>}, {pipeline_mode = #tpu.pipeline_mode<synchronous>, transform_indices = @transform_1, window_bounds = array<i64: 5, 32, 96>}, {pipeline_mode = #tpu.pipeline_mode<synchronous>, transform_indices = @transform_2, window_bounds = array<i64: 5, 32, 1>}, {transform_indices = @transform_3, window_bounds = array<i64: 1, 1, 128>}]} {
    %0 = tpu.iota {dimensions = array<i32: 1>} : vector<1x128xi32>
    %c16_i32 = arith.constant 16 : i32
    %c0_i32 = arith.constant 0 : i32
    %1 = arith.cmpi eq, %c16_i32, %c0_i32 : i32
    %c1_i32 = arith.constant 1 : i32
    %2 = arith.select %1, %c1_i32, %c16_i32 : i32
    %3 = vector.broadcast %2 : i32 to vector<1x128xi32>
    %4 = arith.remsi %0, %3 : vector<1x128xi32>
    %c0_i32_0 = arith.constant 0 : i32
    %5 = vector.broadcast %c0_i32_0 : i32 to vector<1x128xi32>
    %6 = arith.cmpi ne, %4, %5 : vector<1x128xi32>
    %c0_i32_1 = arith.constant 0 : i32
    %7 = vector.broadcast %c0_i32_1 : i32 to vector<1x128xi32>
    %8 = arith.cmpi slt, %4, %7 : vector<1x128xi32>
    %c0_i32_2 = arith.constant 0 : i32
    %9 = arith.cmpi slt, %2, %c0_i32_2 : i32
    %10 = vector.broadcast %9 : i1 to vector<1x128xi1>
    %11 = vector.broadcast %10 : vector<1x128xi1> to vector<1x128xi1>
    %12 = arith.xori %8, %11 : vector<1x128xi1>
    %13 = arith.andi %12, %6 : vector<1x128xi1>
    %14 = vector.broadcast %2 : i32 to vector<1x128xi32>
    %15 = arith.addi %4, %14 : vector<1x128xi32>
    %16 = arith.select %13, %15, %4 : vector<1x128xi1>, vector<1x128xi32>
    %c0_i32_3 = arith.constant 0 : i32
    %17 = vector.broadcast %c0_i32_3 : i32 to vector<1x128xi32>
    %18 = arith.cmpi ne, %16, %17 : vector<1x128xi32>
    %19 = vector.shape_cast %18 : vector<1x128xi1> to vector<1x128xi1>
    %20 = vector.broadcast %19 : vector<1x128xi1> to vector<32x128xi1>
    %c15_i32 = arith.constant 15 : i32
    %21 = vector.broadcast %c15_i32 : i32 to vector<1x128xi32>
    %22 = arith.cmpi ne, %16, %21 : vector<1x128xi32>
    %23 = vector.shape_cast %22 : vector<1x128xi1> to vector<1x128xi1>
    %24 = vector.broadcast %23 : vector<1x128xi1> to vector<32x128xi1>
    %c0 = arith.constant 0 : index
    %c0_4 = arith.constant 0 : index
    %c0_5 = arith.constant 0 : index
    %25 = vector.load %arg1[%c0, %c0_4, %c0_5] : memref<1x16x128xf32, #tpu.memory_space<vmem>>, vector<1x16x128xf32>
    %26 = vector.shape_cast %25 : vector<1x16x128xf32> to vector<16x128xf32>
    %27 = arith.truncf %26 : vector<16x128xf32> to vector<16x128xbf16>
    %28 = vector.extract_strided_slice %20 {offsets = [0, 0], sizes = [16, 128], strides = [1, 1]} : vector<32x128xi1> to vector<16x128xi1>
    %29 = vector.extract_strided_slice %27 {offsets = [0, 127], sizes = [16, 1], strides = [1, 1]} : vector<16x128xbf16> to vector<16x1xbf16>
    %30 = vector.extract_strided_slice %27 {offsets = [0, 0], sizes = [16, 127], strides = [1, 1]} : vector<16x128xbf16> to vector<16x127xbf16>
    %31 = tpu.concatenate %29, %30 in 1 : vector<16x1xbf16>, vector<16x127xbf16> -> vector<16x128xbf16>
    %c0_i32_6 = arith.constant 0 : i32
    %32 = arith.sitofp %c0_i32_6 : i32 to bf16
    %33 = vector.broadcast %32 : bf16 to vector<16x128xbf16>
    %34 = arith.select %28, %31, %33 : vector<16x128xi1>, vector<16x128xbf16>
    %35 = vector.extract_strided_slice %24 {offsets = [0, 0], sizes = [16, 128], strides = [1, 1]} : vector<32x128xi1> to vector<16x128xi1>
    %36 = vector.extract_strided_slice %27 {offsets = [0, 1], sizes = [16, 127], strides = [1, 1]} : vector<16x128xbf16> to vector<16x127xbf16>
    %37 = vector.extract_strided_slice %27 {offsets = [0, 0], sizes = [16, 1], strides = [1, 1]} : vector<16x128xbf16> to vector<16x1xbf16>
    %38 = tpu.concatenate %36, %37 in 1 : vector<16x127xbf16>, vector<16x1xbf16> -> vector<16x128xbf16>
    %c0_i32_7 = arith.constant 0 : i32
    %39 = arith.sitofp %c0_i32_7 : i32 to bf16
    %40 = vector.broadcast %39 : bf16 to vector<16x128xbf16>
    %41 = arith.select %35, %38, %40 : vector<16x128xi1>, vector<16x128xbf16>
    %42 = tpu.concatenate %34, %27, %41 in 0 : vector<16x128xbf16>, vector<16x128xbf16>, vector<16x128xbf16> -> vector<48x128xbf16>
    %c0_8 = arith.constant 0 : index
    %c0_9 = arith.constant 0 : index
    %c0_10 = arith.constant 0 : index
    %43 = vector.load %arg2[%c0_8, %c0_9, %c0_10] : memref<5x32x96xbf16, #tpu.memory_space<vmem>>, vector<1x16x48xbf16>
    %44 = vector.shape_cast %43 : vector<1x16x48xbf16> to vector<16x48xbf16>
    %c0_11 = arith.constant 0 : index
    %c0_12 = arith.constant 0 : index
    %c0_13 = arith.constant 0 : index
    %45 = vector.load %arg3[%c0_11, %c0_12, %c0_13] : memref<5x32x1xf32, #tpu.memory_space<vmem>>, vector<1x16x1xf32>
    %46 = vector.shape_cast %45 : vector<1x16x1xf32> to vector<16x1xf32>
    %cst = arith.constant dense<0.000000e+00> : vector<16x128xf32>
    %47 = tpu.matmul %44, %42, %cst {dimension_numbers = #tpu.dot_dimension_numbers<[1], [0], [0], [1], [0, 0, 1, 1], [], []>} : vector<16x48xbf16>, vector<48x128xbf16>, vector<16x128xf32> -> vector<16x128xf32>
    %48 = vector.broadcast %46 : vector<16x1xf32> to vector<16x128xf32>
    %49 = arith.addf %47, %48 : vector<16x128xf32>
    %cst_14 = arith.constant 0.000000e+00 : f32
    %50 = vector.broadcast %cst_14 : f32 to vector<16x128xf32>
    %51 = arith.cmpf ogt, %49, %50 : vector<16x128xf32>
    %cst_15 = arith.constant 0.00999999977 : f32
    %52 = vector.broadcast %cst_15 : f32 to vector<16x128xf32>
    %53 = arith.mulf %52, %49 : vector<16x128xf32>
    %54 = arith.select %51, %49, %53 : vector<16x128xi1>, vector<16x128xf32>
    %55 = arith.truncf %54 : vector<16x128xf32> to vector<16x128xbf16>
    %56 = vector.extract_strided_slice %20 {offsets = [0, 0], sizes = [16, 128], strides = [1, 1]} : vector<32x128xi1> to vector<16x128xi1>
    %57 = vector.extract_strided_slice %55 {offsets = [0, 127], sizes = [16, 1], strides = [1, 1]} : vector<16x128xbf16> to vector<16x1xbf16>
    %58 = vector.extract_strided_slice %55 {offsets = [0, 0], sizes = [16, 127], strides = [1, 1]} : vector<16x128xbf16> to vector<16x127xbf16>
    %59 = tpu.concatenate %57, %58 in 1 : vector<16x1xbf16>, vector<16x127xbf16> -> vector<16x128xbf16>
    %c0_i32_16 = arith.constant 0 : i32
    %60 = arith.sitofp %c0_i32_16 : i32 to bf16
    %61 = vector.broadcast %60 : bf16 to vector<16x128xbf16>
    %62 = arith.select %56, %59, %61 : vector<16x128xi1>, vector<16x128xbf16>
    %63 = vector.extract_strided_slice %24 {offsets = [0, 0], sizes = [16, 128], strides = [1, 1]} : vector<32x128xi1> to vector<16x128xi1>
    %64 = vector.extract_strided_slice %55 {offsets = [0, 1], sizes = [16, 127], strides = [1, 1]} : vector<16x128xbf16> to vector<16x127xbf16>
    %65 = vector.extract_strided_slice %55 {offsets = [0, 0], sizes = [16, 1], strides = [1, 1]} : vector<16x128xbf16> to vector<16x1xbf16>
    %66 = tpu.concatenate %64, %65 in 1 : vector<16x127xbf16>, vector<16x1xbf16> -> vector<16x128xbf16>
    %c0_i32_17 = arith.constant 0 : i32
    %67 = arith.sitofp %c0_i32_17 : i32 to bf16
    %68 = vector.broadcast %67 : bf16 to vector<16x128xbf16>
    %69 = arith.select %63, %66, %68 : vector<16x128xi1>, vector<16x128xbf16>
    %70 = tpu.concatenate %62, %55, %69 in 0 : vector<16x128xbf16>, vector<16x128xbf16>, vector<16x128xbf16> -> vector<48x128xbf16>
    %c1 = arith.constant 1 : index
    %c0_18 = arith.constant 0 : index
    %c0_19 = arith.constant 0 : index
    %71 = vector.load %arg2[%c1, %c0_18, %c0_19] : memref<5x32x96xbf16, #tpu.memory_space<vmem>>, vector<1x16x48xbf16>
    %72 = vector.shape_cast %71 : vector<1x16x48xbf16> to vector<16x48xbf16>
    %c1_20 = arith.constant 1 : index
    %c0_21 = arith.constant 0 : index
    %c0_22 = arith.constant 0 : index
    %73 = vector.load %arg3[%c1_20, %c0_21, %c0_22] : memref<5x32x1xf32, #tpu.memory_space<vmem>>, vector<1x16x1xf32>
    %74 = vector.shape_cast %73 : vector<1x16x1xf32> to vector<16x1xf32>
    %cst_23 = arith.constant dense<0.000000e+00> : vector<16x128xf32>
    %75 = tpu.matmul %72, %70, %cst_23 {dimension_numbers = #tpu.dot_dimension_numbers<[1], [0], [0], [1], [0, 0, 1, 1], [], []>} : vector<16x48xbf16>, vector<48x128xbf16>, vector<16x128xf32> -> vector<16x128xf32>
    %76 = vector.broadcast %74 : vector<16x1xf32> to vector<16x128xf32>
    %77 = arith.addf %75, %76 : vector<16x128xf32>
    %cst_24 = arith.constant 0.000000e+00 : f32
    %78 = vector.broadcast %cst_24 : f32 to vector<16x128xf32>
    %79 = arith.cmpf ogt, %77, %78 : vector<16x128xf32>
    %cst_25 = arith.constant 0.00999999977 : f32
    %80 = vector.broadcast %cst_25 : f32 to vector<16x128xf32>
    %81 = arith.mulf %80, %77 : vector<16x128xf32>
    %82 = arith.select %79, %77, %81 : vector<16x128xi1>, vector<16x128xf32>
    %83 = arith.truncf %82 : vector<16x128xf32> to vector<16x128xbf16>
    %84 = vector.extract_strided_slice %20 {offsets = [0, 0], sizes = [16, 128], strides = [1, 1]} : vector<32x128xi1> to vector<16x128xi1>
    %85 = vector.extract_strided_slice %83 {offsets = [0, 127], sizes = [16, 1], strides = [1, 1]} : vector<16x128xbf16> to vector<16x1xbf16>
    %86 = vector.extract_strided_slice %83 {offsets = [0, 0], sizes = [16, 127], strides = [1, 1]} : vector<16x128xbf16> to vector<16x127xbf16>
    %87 = tpu.concatenate %85, %86 in 1 : vector<16x1xbf16>, vector<16x127xbf16> -> vector<16x128xbf16>
    %c0_i32_26 = arith.constant 0 : i32
    %88 = arith.sitofp %c0_i32_26 : i32 to bf16
    %89 = vector.broadcast %88 : bf16 to vector<16x128xbf16>
    %90 = arith.select %84, %87, %89 : vector<16x128xi1>, vector<16x128xbf16>
    %91 = vector.extract_strided_slice %24 {offsets = [0, 0], sizes = [16, 128], strides = [1, 1]} : vector<32x128xi1> to vector<16x128xi1>
    %92 = vector.extract_strided_slice %83 {offsets = [0, 1], sizes = [16, 127], strides = [1, 1]} : vector<16x128xbf16> to vector<16x127xbf16>
    %93 = vector.extract_strided_slice %83 {offsets = [0, 0], sizes = [16, 1], strides = [1, 1]} : vector<16x128xbf16> to vector<16x1xbf16>
    %94 = tpu.concatenate %92, %93 in 1 : vector<16x127xbf16>, vector<16x1xbf16> -> vector<16x128xbf16>
    %c0_i32_27 = arith.constant 0 : i32
    %95 = arith.sitofp %c0_i32_27 : i32 to bf16
    %96 = vector.broadcast %95 : bf16 to vector<16x128xbf16>
    %97 = arith.select %91, %94, %96 : vector<16x128xi1>, vector<16x128xbf16>
    %98 = tpu.concatenate %90, %83, %97 in 0 : vector<16x128xbf16>, vector<16x128xbf16>, vector<16x128xbf16> -> vector<48x128xbf16>
    %c2 = arith.constant 2 : index
    %c0_28 = arith.constant 0 : index
    %c0_29 = arith.constant 0 : index
    %99 = vector.load %arg2[%c2, %c0_28, %c0_29] : memref<5x32x96xbf16, #tpu.memory_space<vmem>>, vector<1x32x48xbf16>
    %100 = vector.shape_cast %99 : vector<1x32x48xbf16> to vector<32x48xbf16>
    %c2_30 = arith.constant 2 : index
    %c0_31 = arith.constant 0 : index
    %c0_32 = arith.constant 0 : index
    %101 = vector.load %arg3[%c2_30, %c0_31, %c0_32] : memref<5x32x1xf32, #tpu.memory_space<vmem>>, vector<1x32x1xf32>
    %102 = vector.shape_cast %101 : vector<1x32x1xf32> to vector<32x1xf32>
    %cst_33 = arith.constant dense<0.000000e+00> : vector<32x128xf32>
    %103 = tpu.matmul %100, %98, %cst_33 {dimension_numbers = #tpu.dot_dimension_numbers<[1], [0], [0], [1], [0, 0, 1, 1], [], []>} : vector<32x48xbf16>, vector<48x128xbf16>, vector<32x128xf32> -> vector<32x128xf32>
    %104 = vector.broadcast %102 : vector<32x1xf32> to vector<32x128xf32>
    %105 = arith.addf %103, %104 : vector<32x128xf32>
    %cst_34 = arith.constant 0.000000e+00 : f32
    %106 = vector.broadcast %cst_34 : f32 to vector<32x128xf32>
    %107 = arith.cmpf ogt, %105, %106 : vector<32x128xf32>
    %cst_35 = arith.constant 0.00999999977 : f32
    %108 = vector.broadcast %cst_35 : f32 to vector<32x128xf32>
    %109 = arith.mulf %108, %105 : vector<32x128xf32>
    %110 = arith.select %107, %105, %109 : vector<32x128xi1>, vector<32x128xf32>
    %111 = arith.truncf %110 : vector<32x128xf32> to vector<32x128xbf16>
    %112 = vector.extract_strided_slice %111 {offsets = [0, 127], sizes = [32, 1], strides = [1, 1]} : vector<32x128xbf16> to vector<32x1xbf16>
    %113 = vector.extract_strided_slice %111 {offsets = [0, 0], sizes = [32, 127], strides = [1, 1]} : vector<32x128xbf16> to vector<32x127xbf16>
    %114 = tpu.concatenate %112, %113 in 1 : vector<32x1xbf16>, vector<32x127xbf16> -> vector<32x128xbf16>
    %c0_i32_36 = arith.constant 0 : i32
    %115 = arith.sitofp %c0_i32_36 : i32 to bf16
    %116 = vector.broadcast %115 : bf16 to vector<32x128xbf16>
    %117 = arith.select %20, %114, %116 : vector<32x128xi1>, vector<32x128xbf16>
    %118 = vector.extract_strided_slice %111 {offsets = [0, 1], sizes = [32, 127], strides = [1, 1]} : vector<32x128xbf16> to vector<32x127xbf16>
    %119 = vector.extract_strided_slice %111 {offsets = [0, 0], sizes = [32, 1], strides = [1, 1]} : vector<32x128xbf16> to vector<32x1xbf16>
    %120 = tpu.concatenate %118, %119 in 1 : vector<32x127xbf16>, vector<32x1xbf16> -> vector<32x128xbf16>
    %c0_i32_37 = arith.constant 0 : i32
    %121 = arith.sitofp %c0_i32_37 : i32 to bf16
    %122 = vector.broadcast %121 : bf16 to vector<32x128xbf16>
    %123 = arith.select %24, %120, %122 : vector<32x128xi1>, vector<32x128xbf16>
    %124 = tpu.concatenate %117, %111, %123 in 0 : vector<32x128xbf16>, vector<32x128xbf16>, vector<32x128xbf16> -> vector<96x128xbf16>
    %c3 = arith.constant 3 : index
    %c0_38 = arith.constant 0 : index
    %c0_39 = arith.constant 0 : index
    %125 = vector.load %arg2[%c3, %c0_38, %c0_39] : memref<5x32x96xbf16, #tpu.memory_space<vmem>>, vector<1x32x96xbf16>
    %126 = vector.shape_cast %125 : vector<1x32x96xbf16> to vector<32x96xbf16>
    %c3_40 = arith.constant 3 : index
    %c0_41 = arith.constant 0 : index
    %c0_42 = arith.constant 0 : index
    %127 = vector.load %arg3[%c3_40, %c0_41, %c0_42] : memref<5x32x1xf32, #tpu.memory_space<vmem>>, vector<1x32x1xf32>
    %128 = vector.shape_cast %127 : vector<1x32x1xf32> to vector<32x1xf32>
    %cst_43 = arith.constant dense<0.000000e+00> : vector<32x128xf32>
    %129 = tpu.matmul %126, %124, %cst_43 {dimension_numbers = #tpu.dot_dimension_numbers<[1], [0], [0], [1], [0, 0, 1, 1], [], []>} : vector<32x96xbf16>, vector<96x128xbf16>, vector<32x128xf32> -> vector<32x128xf32>
    %130 = vector.broadcast %128 : vector<32x1xf32> to vector<32x128xf32>
    %131 = arith.addf %129, %130 : vector<32x128xf32>
    %cst_44 = arith.constant 0.000000e+00 : f32
    %132 = vector.broadcast %cst_44 : f32 to vector<32x128xf32>
    %133 = arith.cmpf ogt, %131, %132 : vector<32x128xf32>
    %cst_45 = arith.constant 0.00999999977 : f32
    %134 = vector.broadcast %cst_45 : f32 to vector<32x128xf32>
    %135 = arith.mulf %134, %131 : vector<32x128xf32>
    %136 = arith.select %133, %131, %135 : vector<32x128xi1>, vector<32x128xf32>
    %137 = arith.truncf %136 : vector<32x128xf32> to vector<32x128xbf16>
    %138 = vector.extract_strided_slice %137 {offsets = [0, 127], sizes = [32, 1], strides = [1, 1]} : vector<32x128xbf16> to vector<32x1xbf16>
    %139 = vector.extract_strided_slice %137 {offsets = [0, 0], sizes = [32, 127], strides = [1, 1]} : vector<32x128xbf16> to vector<32x127xbf16>
    %140 = tpu.concatenate %138, %139 in 1 : vector<32x1xbf16>, vector<32x127xbf16> -> vector<32x128xbf16>
    %c0_i32_46 = arith.constant 0 : i32
    %141 = arith.sitofp %c0_i32_46 : i32 to bf16
    %142 = vector.broadcast %141 : bf16 to vector<32x128xbf16>
    %143 = arith.select %20, %140, %142 : vector<32x128xi1>, vector<32x128xbf16>
    %144 = vector.extract_strided_slice %137 {offsets = [0, 1], sizes = [32, 127], strides = [1, 1]} : vector<32x128xbf16> to vector<32x127xbf16>
    %145 = vector.extract_strided_slice %137 {offsets = [0, 0], sizes = [32, 1], strides = [1, 1]} : vector<32x128xbf16> to vector<32x1xbf16>
    %146 = tpu.concatenate %144, %145 in 1 : vector<32x127xbf16>, vector<32x1xbf16> -> vector<32x128xbf16>
    %c0_i32_47 = arith.constant 0 : i32
    %147 = arith.sitofp %c0_i32_47 : i32 to bf16
    %148 = vector.broadcast %147 : bf16 to vector<32x128xbf16>
    %149 = arith.select %24, %146, %148 : vector<32x128xi1>, vector<32x128xbf16>
    %150 = tpu.concatenate %143, %137, %149 in 0 : vector<32x128xbf16>, vector<32x128xbf16>, vector<32x128xbf16> -> vector<96x128xbf16>
    %c4 = arith.constant 4 : index
    %c0_48 = arith.constant 0 : index
    %c0_49 = arith.constant 0 : index
    %151 = vector.load %arg2[%c4, %c0_48, %c0_49] : memref<5x32x96xbf16, #tpu.memory_space<vmem>>, vector<1x8x96xbf16>
    %152 = vector.shape_cast %151 : vector<1x8x96xbf16> to vector<8x96xbf16>
    %c4_50 = arith.constant 4 : index
    %c0_51 = arith.constant 0 : index
    %c0_52 = arith.constant 0 : index
    %153 = vector.load %arg3[%c4_50, %c0_51, %c0_52] : memref<5x32x1xf32, #tpu.memory_space<vmem>>, vector<1x1x1xf32>
    %154 = vector.shape_cast %153 : vector<1x1x1xf32> to vector<1x1xf32>
    %cst_53 = arith.constant dense<0.000000e+00> : vector<8x128xf32>
    %155 = tpu.matmul %152, %150, %cst_53 {dimension_numbers = #tpu.dot_dimension_numbers<[1], [0], [0], [1], [0, 0, 1, 1], [], []>} : vector<8x96xbf16>, vector<96x128xbf16>, vector<8x128xf32> -> vector<8x128xf32>
    %156 = vector.extract_strided_slice %155 {offsets = [0, 0], sizes = [1, 128], strides = [1, 1]} : vector<8x128xf32> to vector<1x128xf32>
    %157 = vector.broadcast %154 : vector<1x1xf32> to vector<1x128xf32>
    %158 = arith.addf %156, %157 : vector<1x128xf32>
    %c32_i32 = arith.constant 32 : i32
    %159 = vector.broadcast %c32_i32 : i32 to vector<1x128xi32>
    %160 = arith.cmpi slt, %0, %159 : vector<1x128xi32>
    %161 = vector.extract_strided_slice %158 {offsets = [0, 1], sizes = [1, 127], strides = [1, 1]} : vector<1x128xf32> to vector<1x127xf32>
    %162 = vector.extract_strided_slice %158 {offsets = [0, 0], sizes = [1, 1], strides = [1, 1]} : vector<1x128xf32> to vector<1x1xf32>
    %163 = tpu.concatenate %161, %162 in 1 : vector<1x127xf32>, vector<1x1xf32> -> vector<1x128xf32>
    %164 = vector.extract_strided_slice %158 {offsets = [0, 113], sizes = [1, 15], strides = [1, 1]} : vector<1x128xf32> to vector<1x15xf32>
    %165 = vector.extract_strided_slice %158 {offsets = [0, 0], sizes = [1, 113], strides = [1, 1]} : vector<1x128xf32> to vector<1x113xf32>
    %166 = tpu.concatenate %164, %165 in 1 : vector<1x15xf32>, vector<1x113xf32> -> vector<1x128xf32>
    %c1_i32_54 = arith.constant 1 : i32
    %167 = vector.broadcast %c1_i32_54 : i32 to vector<1x128xi32>
    %168 = arith.addi %16, %167 : vector<1x128xi32>
    %c16_i32_55 = arith.constant 16 : i32
    %169 = vector.broadcast %c16_i32_55 : i32 to vector<1x128xi32>
    %170 = arith.cmpi slt, %168, %169 : vector<1x128xi32>
    %171 = arith.select %170, %163, %166 : vector<1x128xi1>, vector<1x128xf32>
    %172 = arith.maximumf %158, %171 : vector<1x128xf32>
    %173 = vector.extract_strided_slice %172 {offsets = [0, 2], sizes = [1, 126], strides = [1, 1]} : vector<1x128xf32> to vector<1x126xf32>
    %174 = vector.extract_strided_slice %172 {offsets = [0, 0], sizes = [1, 2], strides = [1, 1]} : vector<1x128xf32> to vector<1x2xf32>
    %175 = tpu.concatenate %173, %174 in 1 : vector<1x126xf32>, vector<1x2xf32> -> vector<1x128xf32>
    %176 = vector.extract_strided_slice %172 {offsets = [0, 114], sizes = [1, 14], strides = [1, 1]} : vector<1x128xf32> to vector<1x14xf32>
    %177 = vector.extract_strided_slice %172 {offsets = [0, 0], sizes = [1, 114], strides = [1, 1]} : vector<1x128xf32> to vector<1x114xf32>
    %178 = tpu.concatenate %176, %177 in 1 : vector<1x14xf32>, vector<1x114xf32> -> vector<1x128xf32>
    %c2_i32 = arith.constant 2 : i32
    %179 = vector.broadcast %c2_i32 : i32 to vector<1x128xi32>
    %180 = arith.addi %16, %179 : vector<1x128xi32>
    %c16_i32_56 = arith.constant 16 : i32
    %181 = vector.broadcast %c16_i32_56 : i32 to vector<1x128xi32>
    %182 = arith.cmpi slt, %180, %181 : vector<1x128xi32>
    %183 = arith.select %182, %175, %178 : vector<1x128xi1>, vector<1x128xf32>
    %184 = arith.maximumf %172, %183 : vector<1x128xf32>
    %185 = vector.extract_strided_slice %184 {offsets = [0, 4], sizes = [1, 124], strides = [1, 1]} : vector<1x128xf32> to vector<1x124xf32>
    %186 = vector.extract_strided_slice %184 {offsets = [0, 0], sizes = [1, 4], strides = [1, 1]} : vector<1x128xf32> to vector<1x4xf32>
    %187 = tpu.concatenate %185, %186 in 1 : vector<1x124xf32>, vector<1x4xf32> -> vector<1x128xf32>
    %188 = vector.extract_strided_slice %184 {offsets = [0, 116], sizes = [1, 12], strides = [1, 1]} : vector<1x128xf32> to vector<1x12xf32>
    %189 = vector.extract_strided_slice %184 {offsets = [0, 0], sizes = [1, 116], strides = [1, 1]} : vector<1x128xf32> to vector<1x116xf32>
    %190 = tpu.concatenate %188, %189 in 1 : vector<1x12xf32>, vector<1x116xf32> -> vector<1x128xf32>
    %c4_i32 = arith.constant 4 : i32
    %191 = vector.broadcast %c4_i32 : i32 to vector<1x128xi32>
    %192 = arith.addi %16, %191 : vector<1x128xi32>
    %c16_i32_57 = arith.constant 16 : i32
    %193 = vector.broadcast %c16_i32_57 : i32 to vector<1x128xi32>
    %194 = arith.cmpi slt, %192, %193 : vector<1x128xi32>
    %195 = arith.select %194, %187, %190 : vector<1x128xi1>, vector<1x128xf32>
    %196 = arith.maximumf %184, %195 : vector<1x128xf32>
    %197 = vector.extract_strided_slice %196 {offsets = [0, 8], sizes = [1, 120], strides = [1, 1]} : vector<1x128xf32> to vector<1x120xf32>
    %198 = vector.extract_strided_slice %196 {offsets = [0, 0], sizes = [1, 8], strides = [1, 1]} : vector<1x128xf32> to vector<1x8xf32>
    %199 = tpu.concatenate %197, %198 in 1 : vector<1x120xf32>, vector<1x8xf32> -> vector<1x128xf32>
    %200 = vector.extract_strided_slice %196 {offsets = [0, 120], sizes = [1, 8], strides = [1, 1]} : vector<1x128xf32> to vector<1x8xf32>
    %201 = vector.extract_strided_slice %196 {offsets = [0, 0], sizes = [1, 120], strides = [1, 1]} : vector<1x128xf32> to vector<1x120xf32>
    %202 = tpu.concatenate %200, %201 in 1 : vector<1x8xf32>, vector<1x120xf32> -> vector<1x128xf32>
    %c8_i32 = arith.constant 8 : i32
    %203 = vector.broadcast %c8_i32 : i32 to vector<1x128xi32>
    %204 = arith.addi %16, %203 : vector<1x128xi32>
    %c16_i32_58 = arith.constant 16 : i32
    %205 = vector.broadcast %c16_i32_58 : i32 to vector<1x128xi32>
    %206 = arith.cmpi slt, %204, %205 : vector<1x128xi32>
    %207 = arith.select %206, %199, %202 : vector<1x128xi1>, vector<1x128xf32>
    %208 = arith.maximumf %196, %207 : vector<1x128xf32>
    %209 = arith.subf %158, %208 : vector<1x128xf32>
    %cst_59 = arith.constant 0xFF800000 : f32
    %210 = vector.broadcast %cst_59 : f32 to vector<1x128xf32>
    %211 = arith.select %160, %209, %210 : vector<1x128xi1>, vector<1x128xf32>
    %212 = math.exp %211 : vector<1x128xf32>
    %c1_i32_60 = arith.constant 1 : i32
    %213 = vector.broadcast %c1_i32_60 : i32 to vector<1x128xi32>
    %214 = arith.addi %16, %213 : vector<1x128xi32>
    %c16_i32_61 = arith.constant 16 : i32
    %215 = vector.broadcast %c16_i32_61 : i32 to vector<1x128xi32>
    %216 = arith.cmpi slt, %214, %215 : vector<1x128xi32>
    %217 = vector.extract_strided_slice %212 {offsets = [0, 1], sizes = [1, 127], strides = [1, 1]} : vector<1x128xf32> to vector<1x127xf32>
    %218 = vector.extract_strided_slice %212 {offsets = [0, 0], sizes = [1, 1], strides = [1, 1]} : vector<1x128xf32> to vector<1x1xf32>
    %219 = tpu.concatenate %217, %218 in 1 : vector<1x127xf32>, vector<1x1xf32> -> vector<1x128xf32>
    %cst_62 = arith.constant 0.000000e+00 : f32
    %220 = vector.broadcast %cst_62 : f32 to vector<1x128xf32>
    %221 = arith.select %216, %219, %220 : vector<1x128xi1>, vector<1x128xf32>
    %222 = arith.addf %212, %221 : vector<1x128xf32>
    %c2_i32_63 = arith.constant 2 : i32
    %223 = vector.broadcast %c2_i32_63 : i32 to vector<1x128xi32>
    %224 = arith.addi %16, %223 : vector<1x128xi32>
    %c16_i32_64 = arith.constant 16 : i32
    %225 = vector.broadcast %c16_i32_64 : i32 to vector<1x128xi32>
    %226 = arith.cmpi slt, %224, %225 : vector<1x128xi32>
    %227 = vector.extract_strided_slice %222 {offsets = [0, 2], sizes = [1, 126], strides = [1, 1]} : vector<1x128xf32> to vector<1x126xf32>
    %228 = vector.extract_strided_slice %222 {offsets = [0, 0], sizes = [1, 2], strides = [1, 1]} : vector<1x128xf32> to vector<1x2xf32>
    %229 = tpu.concatenate %227, %228 in 1 : vector<1x126xf32>, vector<1x2xf32> -> vector<1x128xf32>
    %cst_65 = arith.constant 0.000000e+00 : f32
    %230 = vector.broadcast %cst_65 : f32 to vector<1x128xf32>
    %231 = arith.select %226, %229, %230 : vector<1x128xi1>, vector<1x128xf32>
    %232 = arith.addf %222, %231 : vector<1x128xf32>
    %c4_i32_66 = arith.constant 4 : i32
    %233 = vector.broadcast %c4_i32_66 : i32 to vector<1x128xi32>
    %234 = arith.addi %16, %233 : vector<1x128xi32>
    %c16_i32_67 = arith.constant 16 : i32
    %235 = vector.broadcast %c16_i32_67 : i32 to vector<1x128xi32>
    %236 = arith.cmpi slt, %234, %235 : vector<1x128xi32>
    %237 = vector.extract_strided_slice %232 {offsets = [0, 4], sizes = [1, 124], strides = [1, 1]} : vector<1x128xf32> to vector<1x124xf32>
    %238 = vector.extract_strided_slice %232 {offsets = [0, 0], sizes = [1, 4], strides = [1, 1]} : vector<1x128xf32> to vector<1x4xf32>
    %239 = tpu.concatenate %237, %238 in 1 : vector<1x124xf32>, vector<1x4xf32> -> vector<1x128xf32>
    %cst_68 = arith.constant 0.000000e+00 : f32
    %240 = vector.broadcast %cst_68 : f32 to vector<1x128xf32>
    %241 = arith.select %236, %239, %240 : vector<1x128xi1>, vector<1x128xf32>
    %242 = arith.addf %232, %241 : vector<1x128xf32>
    %c8_i32_69 = arith.constant 8 : i32
    %243 = vector.broadcast %c8_i32_69 : i32 to vector<1x128xi32>
    %244 = arith.addi %16, %243 : vector<1x128xi32>
    %c16_i32_70 = arith.constant 16 : i32
    %245 = vector.broadcast %c16_i32_70 : i32 to vector<1x128xi32>
    %246 = arith.cmpi slt, %244, %245 : vector<1x128xi32>
    %247 = vector.extract_strided_slice %242 {offsets = [0, 8], sizes = [1, 120], strides = [1, 1]} : vector<1x128xf32> to vector<1x120xf32>
    %248 = vector.extract_strided_slice %242 {offsets = [0, 0], sizes = [1, 8], strides = [1, 1]} : vector<1x128xf32> to vector<1x8xf32>
    %249 = tpu.concatenate %247, %248 in 1 : vector<1x120xf32>, vector<1x8xf32> -> vector<1x128xf32>
    %cst_71 = arith.constant 0.000000e+00 : f32
    %250 = vector.broadcast %cst_71 : f32 to vector<1x128xf32>
    %251 = arith.select %246, %249, %250 : vector<1x128xi1>, vector<1x128xf32>
    %252 = arith.addf %242, %251 : vector<1x128xf32>
    %253 = vector.extract_strided_slice %252 {offsets = [0, 1], sizes = [1, 127], strides = [1, 1]} : vector<1x128xf32> to vector<1x127xf32>
    %254 = vector.extract_strided_slice %252 {offsets = [0, 0], sizes = [1, 1], strides = [1, 1]} : vector<1x128xf32> to vector<1x1xf32>
    %255 = tpu.concatenate %253, %254 in 1 : vector<1x127xf32>, vector<1x1xf32> -> vector<1x128xf32>
    %256 = vector.extract_strided_slice %252 {offsets = [0, 113], sizes = [1, 15], strides = [1, 1]} : vector<1x128xf32> to vector<1x15xf32>
    %257 = vector.extract_strided_slice %252 {offsets = [0, 0], sizes = [1, 113], strides = [1, 1]} : vector<1x128xf32> to vector<1x113xf32>
    %258 = tpu.concatenate %256, %257 in 1 : vector<1x15xf32>, vector<1x113xf32> -> vector<1x128xf32>
    %c1_i32_72 = arith.constant 1 : i32
    %259 = vector.broadcast %c1_i32_72 : i32 to vector<1x128xi32>
    %260 = arith.addi %16, %259 : vector<1x128xi32>
    %c16_i32_73 = arith.constant 16 : i32
    %261 = vector.broadcast %c16_i32_73 : i32 to vector<1x128xi32>
    %262 = arith.cmpi slt, %260, %261 : vector<1x128xi32>
    %263 = arith.select %262, %255, %258 : vector<1x128xi1>, vector<1x128xf32>
    %264 = arith.maximumf %252, %263 : vector<1x128xf32>
    %265 = vector.extract_strided_slice %264 {offsets = [0, 2], sizes = [1, 126], strides = [1, 1]} : vector<1x128xf32> to vector<1x126xf32>
    %266 = vector.extract_strided_slice %264 {offsets = [0, 0], sizes = [1, 2], strides = [1, 1]} : vector<1x128xf32> to vector<1x2xf32>
    %267 = tpu.concatenate %265, %266 in 1 : vector<1x126xf32>, vector<1x2xf32> -> vector<1x128xf32>
    %268 = vector.extract_strided_slice %264 {offsets = [0, 114], sizes = [1, 14], strides = [1, 1]} : vector<1x128xf32> to vector<1x14xf32>
    %269 = vector.extract_strided_slice %264 {offsets = [0, 0], sizes = [1, 114], strides = [1, 1]} : vector<1x128xf32> to vector<1x114xf32>
    %270 = tpu.concatenate %268, %269 in 1 : vector<1x14xf32>, vector<1x114xf32> -> vector<1x128xf32>
    %c2_i32_74 = arith.constant 2 : i32
    %271 = vector.broadcast %c2_i32_74 : i32 to vector<1x128xi32>
    %272 = arith.addi %16, %271 : vector<1x128xi32>
    %c16_i32_75 = arith.constant 16 : i32
    %273 = vector.broadcast %c16_i32_75 : i32 to vector<1x128xi32>
    %274 = arith.cmpi slt, %272, %273 : vector<1x128xi32>
    %275 = arith.select %274, %267, %270 : vector<1x128xi1>, vector<1x128xf32>
    %276 = arith.maximumf %264, %275 : vector<1x128xf32>
    %277 = vector.extract_strided_slice %276 {offsets = [0, 4], sizes = [1, 124], strides = [1, 1]} : vector<1x128xf32> to vector<1x124xf32>
    %278 = vector.extract_strided_slice %276 {offsets = [0, 0], sizes = [1, 4], strides = [1, 1]} : vector<1x128xf32> to vector<1x4xf32>
    %279 = tpu.concatenate %277, %278 in 1 : vector<1x124xf32>, vector<1x4xf32> -> vector<1x128xf32>
    %280 = vector.extract_strided_slice %276 {offsets = [0, 116], sizes = [1, 12], strides = [1, 1]} : vector<1x128xf32> to vector<1x12xf32>
    %281 = vector.extract_strided_slice %276 {offsets = [0, 0], sizes = [1, 116], strides = [1, 1]} : vector<1x128xf32> to vector<1x116xf32>
    %282 = tpu.concatenate %280, %281 in 1 : vector<1x12xf32>, vector<1x116xf32> -> vector<1x128xf32>
    %c4_i32_76 = arith.constant 4 : i32
    %283 = vector.broadcast %c4_i32_76 : i32 to vector<1x128xi32>
    %284 = arith.addi %16, %283 : vector<1x128xi32>
    %c16_i32_77 = arith.constant 16 : i32
    %285 = vector.broadcast %c16_i32_77 : i32 to vector<1x128xi32>
    %286 = arith.cmpi slt, %284, %285 : vector<1x128xi32>
    %287 = arith.select %286, %279, %282 : vector<1x128xi1>, vector<1x128xf32>
    %288 = arith.maximumf %276, %287 : vector<1x128xf32>
    %289 = vector.extract_strided_slice %288 {offsets = [0, 8], sizes = [1, 120], strides = [1, 1]} : vector<1x128xf32> to vector<1x120xf32>
    %290 = vector.extract_strided_slice %288 {offsets = [0, 0], sizes = [1, 8], strides = [1, 1]} : vector<1x128xf32> to vector<1x8xf32>
    %291 = tpu.concatenate %289, %290 in 1 : vector<1x120xf32>, vector<1x8xf32> -> vector<1x128xf32>
    %292 = vector.extract_strided_slice %288 {offsets = [0, 120], sizes = [1, 8], strides = [1, 1]} : vector<1x128xf32> to vector<1x8xf32>
    %293 = vector.extract_strided_slice %288 {offsets = [0, 0], sizes = [1, 120], strides = [1, 1]} : vector<1x128xf32> to vector<1x120xf32>
    %294 = tpu.concatenate %292, %293 in 1 : vector<1x8xf32>, vector<1x120xf32> -> vector<1x128xf32>
    %c8_i32_78 = arith.constant 8 : i32
    %295 = vector.broadcast %c8_i32_78 : i32 to vector<1x128xi32>
    %296 = arith.addi %16, %295 : vector<1x128xi32>
    %c16_i32_79 = arith.constant 16 : i32
    %297 = vector.broadcast %c16_i32_79 : i32 to vector<1x128xi32>
    %298 = arith.cmpi slt, %296, %297 : vector<1x128xi32>
    %299 = arith.select %298, %291, %294 : vector<1x128xi1>, vector<1x128xf32>
    %300 = arith.maximumf %288, %299 : vector<1x128xf32>
    %cst_80 = arith.constant 1.000000e+00 : f32
    %301 = vector.broadcast %cst_80 : f32 to vector<1x128xf32>
    %302 = arith.select %160, %300, %301 : vector<1x128xi1>, vector<1x128xf32>
    %303 = arith.divf %212, %302 : vector<1x128xf32>
    %c0_81 = arith.constant 0 : index
    %c0_82 = arith.constant 0 : index
    %c0_83 = arith.constant 0 : index
    %304 = vector.load %arg4[%c0_81, %c0_82, %c0_83] : memref<1x1x128xf32, #tpu.memory_space<vmem>>, vector<1x1x128xf32>
    %305 = vector.shape_cast %304 : vector<1x1x128xf32> to vector<1x128xf32>
    %306 = vector.shape_cast %303 : vector<1x128xf32> to vector<1x1x128xf32>
    tpu.vector_store %arg4[%c0_81, %c0_82, %c0_83], %306 {strides = array<i32>} : memref<1x1x128xf32, #tpu.memory_space<vmem>>, vector<1x1x128xf32>,
    return
  }
  func.func @transform_0(%arg0: i32) -> (i32, i32, i32) {
    %c0_i32 = arith.constant 0 : i32
    %c0_i32_0 = arith.constant 0 : i32
    %c0_i32_1 = arith.constant 0 : i32
    return %arg0, %c0_i32, %c0_i32_0 : i32, i32, i32
  }
  func.func @transform_1(%arg0: i32) -> (i32, i32, i32) {
    %c0_i32 = arith.constant 0 : i32
    %c0_i32_0 = arith.constant 0 : i32
    %c0_i32_1 = arith.constant 0 : i32
    %c0_i32_2 = arith.constant 0 : i32
    return %c0_i32, %c0_i32_0, %c0_i32_1 : i32, i32, i32
  }
  func.func @transform_2(%arg0: i32) -> (i32, i32, i32) {
    %c0_i32 = arith.constant 0 : i32
    %c0_i32_0 = arith.constant 0 : i32
    %c0_i32_1 = arith.constant 0 : i32
    %c0_i32_2 = arith.constant 0 : i32
    return %c0_i32, %c0_i32_0, %c0_i32_1 : i32, i32, i32
  }
  func.func @transform_3(%arg0: i32) -> (i32, i32, i32) {
    %c0_i32 = arith.constant 0 : i32
    %c0_i32_0 = arith.constant 0 : i32
    %c0_i32_1 = arith.constant 0 : i32
    return %arg0, %c0_i32, %c0_i32_0 : i32, i32, i32
  }
}

</mosaic_0001>

<bundles_post_ra>
// kernel: tpu_custom_call.1
= control target key start
LH: loop header
LB: loop body
LE: loop exit
PB: predicated region body
PF: predicated region fallthrough
CT: control target
= control target key end

     0   :  { %v852_v3 = vmov 0.0   ;;  %v853_v4 = vmov 0   ;;  %vm854_vm0 = vmmov 0   ;;  %s855_s18 = smov 127   ;;  %s856_s20 = smov 1   ;;  %s1093_s0 = inlined_call_operand.vmem [shape: f32[1,16,128], index: 0, kind: input, shape index: {}]   ;;  %s1094_s1 = inlined_call_operand.vmem [shape: bf16[5,32,96], index: 1, kind: input, shape index: {}]   ;;  %s1095_s2 = inlined_call_operand.vmem [shape: f32[5,32,1], index: 2, kind: input, shape index: {}]   ;;  %s1096_s3 = inlined_call_operand.hbm [shape: f32[1,1,128], index: 3, kind: output, shape index: {}]  }
   0x1   :  { %v38_v0 = vld [vmem:[%s1093_s0] sm:$0xff]  ;;  %v39_v1 = vld [vmem:[%s1093_s0 + $0x8] sm:$0xff]  ;;  %737 = vmatprep.subr.bf16.mxu0 %v852_v3  ;;  %818 = vset.pattern.permute.xlu1 %v853_v4 }
   0x2   :  { %v40_v2 = vpack.c.bf16 %v39_v1, %v38_v0  ;;  %743 = vmatprep.mubr.msk.bf16.mxu0 %vm854_vm0, %v852_v3  ;;  %v68_v5 = vld [vmem:[%s1095_s2] sm:$0xff]  ;;  %747 = vmatprep.subr.bf16.mxu1 %v852_v3  ;;  %v69_v6 = vld [vmem:[%s1095_s2 + $0x8] sm:$0xff] }
   0x3   :  { %72 = vperm.xlu1 %818, %v68_v5   ;;  %753 = vmatprep.mubr.msk.bf16.mxu1 %vm854_vm0, %v852_v3 }
   0x4   :  { %54 = vrot.lane.b32.xlu0 %v40_v2, %s855_s18 }
   0x5   :  { %819 = vset.pattern.permute.xlu0 %v853_v4 }
   0x7   :  { %77 = vperm.xlu1 %818, %v69_v6  }
   0x8   :  { %42 = vrot.lane.b32.xlu0 %v40_v2, %s856_s20 }
   0x9   :  { %8 = vsyncpa [#allocation3], 0  ;;  %v18_v7 = vlaneseq  ;;  %v820_v20 = vld [vmem:[%s1094_s1] sm:$0xff]   ;;  %vm85_vm7 = vcmask 392192   ;;  %v679_v34 = vld [vmem:[%s1095_s2 + $0x28] sm:$0xff]  ;;  %s857_s29 = smov 15  }
   0xa   :  { %v678_v35 = vld [vmem:[%s1095_s2 + $0x20] sm:$0xff]  ;;  %v821_v40 = vld [vmem:[%s1094_s1 + $0x10] sm:$0xff]   ;;  %v689_v55 = vld [vmem:[%s1095_s2 + $0x58] sm:$0xff]  ;;  %s859_s30 = smov 126   ;;  %s860_s4 = smov 12  }
   0xb   :  { %v905_v8 = vand.u32 127, %v18_v7  ;;  %v49_v10 = vshrl.u32 %v18_v7, 7  ;;  %v822_v51 = vld [vmem:[%s1094_s1 + $0x20] sm:$0xff]   ;;  %v688_v56 = vld [vmem:[%s1095_s2 + $0x50] sm:$0xff]  ;;  %v687_v57 = vld [vmem:[%s1095_s2 + $0x48] sm:$0xff]  ;;  %s861_s5 = smov 124  }
   0xc   :  { %v686_v58 = vld [vmem:[%s1095_s2 + $0x40] sm:$0xff]  ;;  %v823_v63 = vld [vmem:[%s1094_s1 + $0x28] sm:$0xff]   ;;  %s862_s6 = smov 8   ;;  %s863_s7 = smov 120  }
   0xd   :  { %v908_v9 = vand.u32 15, %v905_v8  ;;  %v50_v11 = vsub.s32 0, %v49_v10 }
   0xf   :  { %vm35_vm1 = vcmp.ne.s32.totalorder %v908_v9, 15  ;;  %vm32_vm3 = vcmp.ne.s32.totalorder %v908_v9, 0 }
  0x10   :  { %vm58_vm2 = vmpackc.low %vm35_vm1, %vm35_vm1 }
  0x11   :  { %v59_v12 = vsel %vm58_vm2, 65537, %v853_v4  ;;  %vm46_vm4 = vmpackc.low %vm32_vm3, %vm32_vm3 }
  0x12   :  { %v912_v13 = vrot.slane %v59_v12, %v50_v11  ;;  %v47_v14 = vsel %vm46_vm4, 65537, %v853_v4 }
  0x13   :  { %v915_v16 = vrot.slane %v47_v14, %v50_v11 }
  0x14   :  { %vm64_vm5 = vcmp.ne.s16.totalorder %v912_v13, 0 }
  0x15   :  { %vm52_vm6 = vcmp.ne.s16.totalorder %v915_v16, 0  ;;  %v1046_v16 = vadd.s32 1, %v908_v9 }
  0x76   :  { %v55_v15 = vpop.permute.xlu0 %54 }
  0x77   :  { %v65_v17 = vsel %vm64_vm5, %v55_v15, 0 }
  0x78   :  { %738 = vmatpush3.bf16.msra.mxu0 %v65_v17 }
  0x79   :  { %739 = vmatprep.subr.bf16.mxu0 %v852_v3 }
  0x7a   :  { %v43_v18 = vpop.permute.xlu0 %42 }
  0x7b   :  { %v53_v19 = vsel %vm52_vm6, %v43_v18, 0 }
  0x7c   :  { %740 = vmatpush3.bf16.msra.mxu0 %v40_v2 }
  0x7d   :  { %741 = vmatprep.subr.bf16.mxu0 %v852_v3 }
  0x7e   :  { %v73_v21 = vpop.permute.xlu1 %72 }
  0x80   :  { %742 = vmatpush3.bf16.msra.mxu0 %v53_v19 }
  0x82   :  { %v78_v25 = vpop.permute.xlu1 %77 }
  0x83   :  { %744 = vmatmul.mubr.msk.bf16.vlgmr.msra.gmra.mxu0 %vm85_vm7, %v820_v20 }
  0x84   :  { %763 = vmatprep.mubr.msk.bf16.mxu0 %vm85_vm7, %v822_v51 }
 0x143   :  { %v123_v22 = vpop.f32.mrf.mxu0 }
 0x144   :  { %v124_v23 = vadd.f32 %v123_v22, %v73_v21 }
 0x145   :  { %v745_v24 = vpop.f32.mrf.mxu0 }
 0x146   :  { %v132_v27 = vmul.f32 0.01, %v124_v23  ;;  %vm130_vm8 = vcmp.gt.f32.partialorder %v124_v23, 0.0 }
 0x147   :  { %v126_v26 = vpop.f32.mrf.mxu0 }
 0x148   :  { %v127_v28 = vadd.f32 %v126_v26, %v78_v25  ;;  %v134_v31 = vsel %vm130_vm8, %v124_v23, %v132_v27  ;;  %v700_v27 = vld [vmem:[%s1095_s2 + $0x70] sm:$0xff] }
 0x149   :  { %v746_v29 = vpop.f32.mrf.mxu0 }
 0x14a   :  { %vm131_vm9 = vcmp.gt.f32.partialorder %v127_v28, 0.0  ;;  %v133_v30 = vmul.f32 0.01, %v127_v28  ;;  %v824_v29 = vld [vmem:[%s1094_s1 + $0x30] sm:$0xff]  }
 0x14c   :  { %v135_v32 = vsel %vm131_vm9, %v127_v28, %v133_v30  ;;  %v701_v28 = vld [vmem:[%s1095_s2 + $0x78] sm:$0xff]  ;;  %v698_v30 = vld [vmem:[%s1095_s2 + $0x60] sm:$0xff]  ;;  %vm547_vm9 = vcmp.lt.s32.totalorder %v905_v8, 32 }
 0x14d   :  { %v136_v33 = vpack.c.bf16 %v135_v32, %v134_v31  ;;  %v699_v31 = vld [vmem:[%s1095_s2 + $0x68] sm:$0xff] }
 0x14f   :  { %138 = vrot.lane.b32.xlu1 %v136_v33, %s856_s20  ;;  %143 = vrot.lane.b32.xlu0 %v136_v33, %s855_s18 }
 0x153   :  { %161 = vperm.xlu1 %818, %v679_v34   ;;  %156 = vperm.xlu0 %819, %v678_v35  }
 0x1c1   :  { %v144_v36 = vpop.permute.xlu0 %143  ;;  %v139_v38 = vpop.permute.xlu1 %138 }
 0x1c2   :  { %v147_v37 = vsel %vm64_vm5, %v144_v36, 0  ;;  %v142_v39 = vsel %vm52_vm6, %v139_v38, 0 }
 0x1c3   :  { %748 = vmatpush3.bf16.msra.mxu1 %v147_v37 }
 0x1c4   :  { %749 = vmatprep.subr.bf16.mxu1 %v852_v3 }
 0x1c7   :  { %750 = vmatpush3.bf16.msra.mxu1 %v136_v33 }
 0x1c8   :  { %751 = vmatprep.subr.bf16.mxu1 %v852_v3 }
 0x1cb   :  { %752 = vmatpush3.bf16.msra.mxu1 %v142_v39 }
 0x1ce   :  { %754 = vmatmul.mubr.msk.bf16.vlgmr.msra.gmra.mxu1 %vm85_vm7, %v821_v40  ;;  %v157_v41 = vpop.permute.xlu0 %156  ;;  %v162_v45 = vpop.permute.xlu1 %161  ;;  %v825_v40 = vld [vmem:[%s1094_s1 + $0x38] sm:$0xff]  }
 0x28e   :  { %v206_v42 = vpop.f32.mrf.mxu1 }
 0x28f   :  { %v207_v43 = vadd.f32 %v206_v42, %v157_v41 }
 0x290   :  { %v755_v44 = vpop.f32.mrf.mxu1 }
 0x291   :  { %v215_v47 = vmul.f32 0.01, %v207_v43  ;;  %vm213_vm10 = vcmp.gt.f32.partialorder %v207_v43, 0.0 }
 0x292   :  { %v209_v46 = vpop.f32.mrf.mxu1 }
 0x293   :  { %v210_v48 = vadd.f32 %v209_v46, %v162_v45  ;;  %v217_v52 = vsel %vm213_vm10, %v207_v43, %v215_v47 }
 0x294   :  { %v756_v49 = vpop.f32.mrf.mxu1 }
 0x295   :  { %vm214_vm11 = vcmp.gt.f32.partialorder %v210_v48, 0.0  ;;  %v216_v50 = vmul.f32 0.01, %v210_v48 }
 0x297   :  { %v218_v53 = vsel %vm214_vm11, %v210_v48, %v216_v50 }
 0x298   :  { %v219_v54 = vpack.c.bf16 %v218_v53, %v217_v52 }
 0x29a   :  { %221 = vrot.lane.b32.xlu0 %v219_v54, %s856_s20  ;;  %226 = vrot.lane.b32.xlu1 %v219_v54, %s855_s18 }
 0x29e   :  { %258 = vperm.xlu0 %819, %v689_v55   ;;  %253 = vperm.xlu1 %818, %v688_v56  }
 0x2a2   :  { %248 = vperm.xlu0 %819, %v687_v57   ;;  %243 = vperm.xlu1 %818, %v686_v58  }
 0x30c   :  { %v227_v59 = vpop.permute.xlu1 %226  ;;  %v222_v61 = vpop.permute.xlu0 %221 }
 0x30d   :  { %v230_v60 = vsel %vm64_vm5, %v227_v59, 0  ;;  %799 = vmatprep.subr.msk.bf16.mxu0 %vm64_vm5, %v227_v59  ;;  %v225_v62 = vsel %vm52_vm6, %v222_v61, 0 }
 0x30e   :  { %758 = vmatpush3.bf16.msra.mxu0 %v230_v60 }
 0x30f   :  { %759 = vmatprep.subr.bf16.mxu0 %v219_v54 }
 0x312   :  { %760 = vmatpush3.bf16.msra.mxu0 %v219_v54 }
 0x313   :  { %800 = vmatprep.subr.msk.bf16.mxu0 %vm52_vm6, %v222_v61 }
 0x316   :  { %762 = vmatpush3.bf16.msra.mxu0 %v225_v62 }
 0x317   :  { %783 = vmatprep.subr.bf16.mxu0 %v852_v3 }
 0x319   :  { %764 = vmatmul.mubr.msk.bf16.vlgmr.msra.gmra.mxu0 %vm85_vm7, %v823_v63  ;;  %v254_v0 = vpop.permute.xlu1 %253  ;;  %v259_v1 = vpop.permute.xlu0 %258  ;;  %v707_v63 = vld [vmem:[%s1095_s2 + $0x80] sm:$0x1] }
 0x31a   :  { %795 = vmatprep.mubr.msk.bf16.mxu0 %vm854_vm0, %v852_v3  ;;  %vm402_vm0 = vcmask 785408  }
 0x31b   :  { %779 = vmatprep.mubr.msk.bf16.mxu1 %vm402_vm0, %v824_v29 }
 0x31d   :  { %v244_v5 = vpop.permute.xlu1 %243  ;;  %v249_v14 = vpop.permute.xlu0 %248 }
 0x3d9   :  { %v765_v2 = vpop.f32.mrf.mxu0 }
 0x3da   :  { %v320_v4 = vadd.f32 %v765_v2, %v254_v0 }
 0x3db   :  { %v311_v6 = vpop.f32.mrf.mxu0 }
 0x3dc   :  { %v312_v7 = vadd.f32 %v311_v6, %v244_v5  ;;  %v332_v11 = vmul.f32 0.01, %v320_v4  ;;  %vm328_vm12 = vcmp.gt.f32.partialorder %v320_v4, 0.0 }
 0x3dd   :  { %v766_v10 = vpop.f32.mrf.mxu0 }
 0x3de   :  { %v323_v12 = vadd.f32 %v766_v10, %v259_v1  ;;  %v330_v17 = vmul.f32 0.01, %v312_v7  ;;  %vm326_vm14 = vcmp.gt.f32.partialorder %v312_v7, 0.0  ;;  %v336_v20 = vsel %vm328_vm12, %v320_v4, %v332_v11  ;;  %v706_v10 = vld [vmem:[%s1094_s1 + $0x40] sm:$0xf]  ;;  %s858_s1 = smov 14  }
 0x3df   :  { %v314_v15 = vpop.f32.mrf.mxu0 }
 0x3e0   :  { %vm329_vm13 = vcmp.gt.f32.partialorder %v323_v12, 0.0  ;;  %v333_v18 = vmul.f32 0.01, %v323_v12  ;;  %v315_v19 = vadd.f32 %v314_v15, %v249_v14  ;;  %v334_v24 = vsel %vm326_vm14, %v312_v7, %v330_v17 }
 0x3e2   :  { %v337_v21 = vsel %vm329_vm13, %v323_v12, %v333_v18  ;;  %vm327_vm15 = vcmp.gt.f32.partialorder %v315_v19, 0.0  ;;  %v331_v22 = vmul.f32 0.01, %v315_v19 }
 0x3e3   :  { %v339_v23 = vpack.c.bf16 %v337_v21, %v336_v20 }
 0x3e4   :  { %v335_v25 = vsel %vm327_vm15, %v315_v19, %v331_v22  ;;  %v566_v22 = vadd.s32 2, %v908_v9 }
 0x3e5   :  { %v338_v26 = vpack.c.bf16 %v335_v25, %v334_v24  ;;  %354 = vrot.lane.b32.xlu1 %v339_v23, %s855_s18 }
 0x3e7   :  { %352 = vrot.lane.b32.xlu0 %v338_v26, %s855_s18 }
 0x3e9   :  { %344 = vrot.lane.b32.xlu1 %v339_v23, %s856_s20 }
 0x3eb   :  { %342 = vrot.lane.b32.xlu0 %v338_v26, %s856_s20 }
 0x3ed   :  { %384 = vperm.xlu1 %818, %v700_v27   ;;  %v577_v27 = vadd.s32 4, %v908_v9 }
 0x3ef   :  { %389 = vperm.xlu0 %819, %v701_v28   ;;  %vm578_vm7 = vcmp.lt.s32.totalorder %v577_v27, 16 }
 0x3f1   :  { %374 = vperm.xlu1 %818, %v698_v30  }
 0x3f3   :  { %379 = vperm.xlu0 %819, %v699_v31  }
 0x457   :  { %v355_v32 = vpop.permute.xlu1 %354 }
 0x458   :  { %v361_v33 = vsel %vm64_vm5, %v355_v32, 0  ;;  %801 = vmatprep.subr.msk.bf16.mxu1 %vm64_vm5, %v355_v32  ;;  %v588_v32 = vadd.s32 8, %v908_v9 }
 0x459   :  { %768 = vmatpush3.bf16.msra.mxu1 %v361_v33  ;;  %v353_v34 = vpop.permute.xlu0 %352 }
 0x45a   :  { %802 = vmatprep.subr.msk.bf16.mxu1 %vm64_vm5, %v353_v34  ;;  %v360_v35 = vsel %vm64_vm5, %v353_v34, 0  ;;  %vm589_vm8 = vcmp.lt.s32.totalorder %v588_v32, 16 }
 0x45b   :  { %v345_v36 = vpop.permute.xlu1 %344 }
 0x45c   :  { %v351_v37 = vsel %vm52_vm6, %v345_v36, 0 }
 0x45d   :  { %770 = vmatpush3.bf16.msra.mxu1 %v360_v35  ;;  %v343_v38 = vpop.permute.xlu0 %342 }
 0x45e   :  { %771 = vmatprep.subr.bf16.mxu1 %v339_v23  ;;  %v350_v39 = vsel %vm52_vm6, %v343_v38, 0 }
 0x461   :  { %772 = vmatpush3.bf16.msra.mxu1 %v339_v23 }
 0x462   :  { %773 = vmatprep.subr.bf16.mxu1 %v338_v26 }
 0x465   :  { %774 = vmatpush3.bf16.msra.mxu1 %v338_v26 }
 0x466   :  { %803 = vmatprep.subr.msk.bf16.mxu1 %vm52_vm6, %v345_v36 }
 0x468   :  { %v385_v41 = vpop.permute.xlu1 %384 }
 0x469   :  { %776 = vmatpush3.bf16.msra.mxu1 %v351_v37 }
 0x46a   :  { %804 = vmatprep.subr.msk.bf16.mxu1 %vm52_vm6, %v343_v38  ;;  %v390_v42 = vpop.permute.xlu0 %389 }
 0x46c   :  { %v375_v45 = vpop.permute.xlu1 %374 }
 0x46d   :  { %778 = vmatpush3.bf16.msra.mxu1 %v350_v39 }
 0x46e   :  { %v380_v51 = vpop.permute.xlu0 %379 }
 0x470   :  { %780 = vmatmul.mubr.msk.bf16.vlgmr.msra.gmra.mxu1 %vm402_vm0, %v825_v40 }
 0x530   :  { %v781_v43 = vpop.f32.mrf.mxu1 }
 0x531   :  { %v452_v44 = vadd.f32 %v781_v43, %v385_v41 }
 0x532   :  { %v443_v46 = vpop.f32.mrf.mxu1 }
 0x533   :  { %v444_v47 = vadd.f32 %v443_v46, %v375_v45  ;;  %v464_v49 = vmul.f32 0.01, %v452_v44  ;;  %vm460_vm1 = vcmp.gt.f32.partialorder %v452_v44, 0.0 }
 0x534   :  { %v782_v48 = vpop.f32.mrf.mxu1 }
 0x535   :  { %v455_v50 = vadd.f32 %v782_v48, %v390_v42  ;;  %v462_v53 = vmul.f32 0.01, %v444_v47  ;;  %vm458_vm3 = vcmp.gt.f32.partialorder %v444_v47, 0.0  ;;  %v468_v57 = vsel %vm460_vm1, %v452_v44, %v464_v49 }
 0x536   :  { %v446_v52 = vpop.f32.mrf.mxu1 }
 0x537   :  { %vm461_vm2 = vcmp.gt.f32.partialorder %v455_v50, 0.0  ;;  %v465_v54 = vmul.f32 0.01, %v455_v50  ;;  %v447_v55 = vadd.f32 %v446_v52, %v380_v51  ;;  %v466_v60 = vsel %vm458_vm3, %v444_v47, %v462_v53 }
 0x539   :  { %vm459_vm4 = vcmp.gt.f32.partialorder %v447_v55, 0.0  ;;  %v463_v56 = vmul.f32 0.01, %v447_v55  ;;  %v469_v58 = vsel %vm461_vm2, %v455_v50, %v465_v54 }
 0x53a   :  { %v471_v59 = vpack.c.bf16 %v469_v58, %v468_v57 }
 0x53b   :  { %v467_v61 = vsel %vm459_vm4, %v447_v55, %v463_v56 }
 0x53c   :  { %486 = vrot.lane.b32.xlu1 %v471_v59, %s855_s18  ;;  %v470_v62 = vpack.c.bf16 %v467_v61, %v466_v60 }
 0x53e   :  { %484 = vrot.lane.b32.xlu0 %v470_v62, %s855_s18 }
 0x540   :  { %476 = vrot.lane.b32.xlu1 %v471_v59, %s856_s20 }
 0x542   :  { %474 = vrot.lane.b32.xlu0 %v470_v62, %s856_s20 }
 0x544   :  { %543 = vperm.xlu1 %818, %v707_v63  }
 0x5ae   :  { %v487_v0 = vpop.permute.xlu1 %486 }
 0x5af   :  { %v493_v1 = vsel %vm64_vm5, %v487_v0, 0 }
 0x5b0   :  { %784 = vmatpush3.bf16.msra.mxu0 %v493_v1  ;;  %v485_v2 = vpop.permute.xlu0 %484 }
 0x5b1   :  { %785 = vmatprep.subr.bf16.mxu0 %v852_v3  ;;  %v492_v4 = vsel %vm64_vm5, %v485_v2, 0  ;;  %vm556_vm5 = vcmp.lt.s32.totalorder %v1046_v16, 16 }
 0x5b2   :  { %v477_v5 = vpop.permute.xlu1 %476 }
 0x5b3   :  { %v483_v6 = vsel %vm52_vm6, %v477_v5, 0 }
 0x5b4   :  { %786 = vmatpush3.bf16.msra.mxu0 %v492_v4  ;;  %v475_v7 = vpop.permute.xlu0 %474 }
 0x5b5   :  { %787 = vmatprep.subr.bf16.mxu0 %v852_v3  ;;  %v482_v13 = vsel %vm52_vm6, %v475_v7, 0  ;;  %vm567_vm6 = vcmp.lt.s32.totalorder %v566_v22, 16 }
 0x5b8   :  { %788 = vmatpush3.bf16.msra.mxu0 %v471_v59 }
 0x5b9   :  { %789 = vmatprep.subr.bf16.mxu0 %v852_v3 }
 0x5bc   :  { %790 = vmatpush3.bf16.msra.mxu0 %v470_v62 }
 0x5bd   :  { %791 = vmatprep.subr.bf16.mxu0 %v852_v3 }
 0x5bf   :  { %v544_v11 = vpop.permute.xlu1 %543 }
 0x5c0   :  { %792 = vmatpush3.bf16.msra.mxu0 %v483_v6 }
 0x5c1   :  { %793 = vmatprep.subr.bf16.mxu0 %v852_v3 }
 0x5c4   :  { %794 = vmatpush3.bf16.msra.mxu0 %v482_v13 }
 0x5c7   :  { %796 = vmatmul.mubr.msk.bf16.vlgmr.msra.gmra.mxu0 %vm402_vm0, %v706_v10 }
 0x687   :  { %v535_v12 = vpop.f32.mrf.mxu0 }
 0x688   :  { %v546_v14 = vadd.f32 %v544_v11, %v535_v12 }
 0x689   :  { %v797_v15 = vpop.f32.mrf.mxu0 }
 0x68a   :  { %552 = vrot.lane.b32.xlu1 %v546_v14, %s857_s29  ;;  %549 = vrot.lane.b32.xlu0 %v546_v14, %s855_s18 }
 0x68b   :  { %v538_v3 = vpop.f32.mrf.mxu0 }
 0x68d   :  { %v798_v17 = vpop.f32.mrf.mxu0 }
 0x6fc   :  { %v553_v18 = vpop.permute.xlu1 %552  ;;  %v550_v19 = vpop.permute.xlu0 %549 }
 0x6fd   :  { %v557_v20 = vsel %vm556_vm5, %v550_v19, %v553_v18 }
 0x6fe   :  { %v558_v21 = vmax.f32 %v546_v14, %v557_v20 }
 0x700   :  { %563 = vrot.lane.b32.xlu1 %v558_v21, %s858_s1  ;;  %560 = vrot.lane.b32.xlu0 %v558_v21, %s859_s30 }
 0x772   :  { %v564_v23 = vpop.permute.xlu1 %563  ;;  %v561_v24 = vpop.permute.xlu0 %560 }
 0x773   :  { %v568_v25 = vsel %vm567_vm6, %v561_v24, %v564_v23 }
 0x774   :  { %v569_v26 = vmax.f32 %v558_v21, %v568_v25 }
 0x776   :  { %574 = vrot.lane.b32.xlu1 %v569_v26, %s860_s4  ;;  %571 = vrot.lane.b32.xlu0 %v569_v26, %s861_s5 }
 0x7e8   :  { %v575_v28 = vpop.permute.xlu1 %574  ;;  %v572_v29 = vpop.permute.xlu0 %571 }
 0x7e9   :  { %v579_v30 = vsel %vm578_vm7, %v572_v29, %v575_v28 }
 0x7ea   :  { %v580_v31 = vmax.f32 %v569_v26, %v579_v30 }
 0x7ec   :  { %585 = vrot.lane.b32.xlu1 %v580_v31, %s862_s6  ;;  %582 = vrot.lane.b32.xlu0 %v580_v31, %s863_s7 }
 0x85e   :  { %v586_v33 = vpop.permute.xlu1 %585  ;;  %v583_v34 = vpop.permute.xlu0 %582 }
 0x85f   :  { %v590_v35 = vsel %vm589_vm8, %v583_v34, %v586_v33 }
 0x860   :  { %v591_v36 = vmax.f32 %v580_v31, %v590_v35 }
 0x862   :  { %v592_v37 = vsub.f32 %v546_v14, %v591_v36 }
 0x864   :  { %v593_v38 = vsel %vm547_vm9, %v592_v37, -inf }
 0x865   :  { %v594_v39 = vmul.f32 1.442695, %v593_v38 }
 0x867   :  { %826 = vpow2.f32 %v594_v39 }
 0x874   :  { %v827_v40 = vpop.eup %826 }
 0x875   :  { %597 = vrot.lane.b32.xlu0 %v827_v40, %s855_s18 }
 0x8e7   :  { %v598_v41 = vpop.permute.xlu0 %597 }
 0x8e8   :  { %v600_v9 = vsel %vm556_vm5, %v598_v41, 0.0 }
 0x8e9   :  { %v601_v42 = vadd.f32 %v827_v40, %v600_v9 }
 0x8eb   :  { %603 = vrot.lane.b32.xlu1 %v601_v42, %s859_s30 }
 0x95d   :  { %v604_v43 = vpop.permute.xlu1 %603 }
 0x95e   :  { %v606_v44 = vsel %vm567_vm6, %v604_v43, 0.0 }
 0x95f   :  { %v607_v45 = vadd.f32 %v606_v44, %v601_v42 }
 0x961   :  { %609 = vrot.lane.b32.xlu0 %v607_v45, %s861_s5 }
 0x9d3   :  { %v610_v46 = vpop.permute.xlu0 %609 }
 0x9d4   :  { %v612_v47 = vsel %vm578_vm7, %v610_v46, 0.0 }
 0x9d5   :  { %v613_v48 = vadd.f32 %v612_v47, %v607_v45 }
 0x9d7   :  { %615 = vrot.lane.b32.xlu1 %v613_v48, %s863_s7 }
 0xa49   :  { %v616_v49 = vpop.permute.xlu1 %615 }
 0xa4a   :  { %v618_v50 = vsel %vm589_vm8, %v616_v49, 0.0 }
 0xa4b   :  { %v619_v51 = vadd.f32 %v618_v50, %v613_v48 }
 0xa4d   :  { %624 = vrot.lane.b32.xlu1 %v619_v51, %s857_s29  ;;  %621 = vrot.lane.b32.xlu0 %v619_v51, %s855_s18  ;;  %s864_s18 = smov [#allocation2]  }
 0xa4e   :  { %s666_s8 = sshll.u32 %s864_s18, 4  ;;  %s667_s8 = int_to_ptr.vmem [resolvable:$true] %s666_s8 }
 0xa4f   :  { %s830_s9 = scalar_lea.vmem %s667_s8, 16  ;;  %s834_s10 = scalar_lea.vmem %s667_s8, 32 }
 0xa50   :  { %p831_p0 = scmp.ne.s32.totalorder %s667_s8, %s830_s9  ;;  %p835_p1 = scmp.lt.s32.totalorder %s667_s8, %s667_s8 }
 0xa51   :  { %p836_p2 = scmp.lt.s32.totalorder %s834_s10, %s830_s9 }
 0xa53   :  { %p837_p3 = por %p836_p2, %p835_p1 }
 0xa55   :  { %p838_p4 = pnand %p837_p3, %p831_p0 }
 0xabf   :  { %v625_v52 = vpop.permute.xlu1 %624  ;;  %v622_v53 = vpop.permute.xlu0 %621 }
 0xac0   :  { %v627_v54 = vsel %vm556_vm5, %v622_v53, %v625_v52 }
 0xac1   :  { %v628_v55 = vmax.f32 %v619_v51, %v627_v54 }
 0xac3   :  { %633 = vrot.lane.b32.xlu1 %v628_v55, %s858_s1  ;;  %630 = vrot.lane.b32.xlu0 %v628_v55, %s859_s30 }
 0xb35   :  { %v634_v56 = vpop.permute.xlu1 %633  ;;  %v631_v57 = vpop.permute.xlu0 %630 }
 0xb36   :  { %v636_v58 = vsel %vm567_vm6, %v631_v57, %v634_v56 }
 0xb37   :  { %v637_v59 = vmax.f32 %v628_v55, %v636_v58 }
 0xb39   :  { %642 = vrot.lane.b32.xlu1 %v637_v59, %s860_s4  ;;  %639 = vrot.lane.b32.xlu0 %v637_v59, %s861_s5 }
 0xbab   :  { %v643_v60 = vpop.permute.xlu1 %642  ;;  %v640_v61 = vpop.permute.xlu0 %639 }
 0xbac   :  { %v645_v62 = vsel %vm578_vm7, %v640_v61, %v643_v60 }
 0xbad   :  { %v646_v63 = vmax.f32 %v637_v59, %v645_v62 }
 0xbaf   :  { %651 = vrot.lane.b32.xlu1 %v646_v63, %s862_s6  ;;  %648 = vrot.lane.b32.xlu0 %v646_v63, %s863_s7 }
 0xc21   :  { %v652_v0 = vpop.permute.xlu1 %651  ;;  %v649_v1 = vpop.permute.xlu0 %648 }
 0xc22   :  { %v654_v2 = vsel %vm589_vm8, %v649_v1, %v652_v0 }
 0xc23   :  { %v655_v4 = vmax.f32 %v646_v63, %v654_v2 }
 0xc25   :  { %v656_v5 = vsel %vm547_vm9, %v655_v4, 1.0 }
 0xc26   :  { %828 = vrcp.f32 %v656_v5 }
 0xc33   :  { %v829_v6 = vpop.eup %828 }
 0xc34   :  { %v658_v7 = vmul.f32 %v829_v6, %v827_v40 }
 0xc36   :  { %659 = vst [vmem:[#allocation2] sm:$0x1] %v658_v7 }
 0xc37   :  { %841 = shalt.err (!%p838_p4)
}
 0xc38   :  { %669 = dma.vmem_to_hbm [thread:$0]  %s667_s8, 16, %s1096_s3, [#allocation3]  }
 0xc39   :  { %850 = dma.done.wait [#allocation3], 16  }
 0xc3a   :  { %851 = vsyncadd [#allocation3], 4294967280 }
 0xc3b   :  { %673 = vsyncpa [#allocation3], 1 }

</bundles_post_ra>
